<compile_context>
chip_gen: v7x
topology: tpu7x:2x2x1
jax: 0.10.0
libtpu: 0.0.40
codegen_flags: <defaults>
</compile_context>

<pallas_src>
import numpy as np
import jax
import jax.numpy as jnp
from jax.experimental import pallas as pl
from jax.experimental.pallas import tpu as pltpu

INPUT_SIZE = 945   # 45 groups * 21
E_NODE = 94
HID = 105
PAD = 128          # lane-aligned width for the hidden feature dims
TB_MAX = 512       # batch-tile rows; fits 16 MiB scoped VMEM with 2-deep buffering


def _round_up(n, m):
    return (n + m - 1) // m * m


# ---------------------------------------------------------------------------
# Fused kernel: encoder -> (Linear, tanh) -> (Linear, tanh) -> Linear
# Weights arrive pre-transposed (in_features, out_features) and zero-padded to
# 128-wide hidden dims; biases are (1, width). All compute/accumulation in f32.
# ---------------------------------------------------------------------------
def csmodule_kernel(x_ref,
                    we_ref, be_ref,      # encoder:   (945, 128), (1, 128)
                    w1_ref, b1_ref,      # decoder0:  (128, 128), (1, 128)
                    w2_ref, b2_ref,      # decoder2:  (128, 128), (1, 128)
                    w3_ref, b3_ref,      # decoder4:  (128, 945), (1, 945)
                    out_ref):
    x = x_ref[...].astype(jnp.float32)
    e = jnp.dot(x, we_ref[...], preferred_element_type=jnp.float32) + be_ref[...]
    h = jnp.tanh(jnp.dot(e, w1_ref[...], preferred_element_type=jnp.float32) + b1_ref[...])
    h = jnp.tanh(jnp.dot(h, w2_ref[...], preferred_element_type=jnp.float32) + b2_ref[...])
    out_ref[...] = jnp.dot(h, w3_ref[...], preferred_element_type=jnp.float32) + b3_ref[...]


def csmodule_forward(x, kparams):
    """Full CSmodule forward. x: (B, 945) any float dtype -> (B, 945) f32."""
    B = x.shape[0]
    TB = min(TB_MAX, _round_up(B, 8))          # full (8, ·) sublane tiles even at tiny B
    Bp = _round_up(B, TB)
    if Bp != B:
        x = jnp.pad(x, ((0, Bp - B), (0, 0)))
    grid = (Bp // TB,)

    def row_spec(width):
        return pl.BlockSpec((TB, width), lambda i: (i, 0))

    def whole(shape):
        # Constant block index -> weight/bias stays resident in VMEM across the grid.
        return pl.BlockSpec(shape, lambda i: (0, 0))

    flops = 2 * Bp * (INPUT_SIZE * PAD + PAD * PAD + PAD * PAD + PAD * INPUT_SIZE)
    weight_bytes = 4 * (INPUT_SIZE * PAD + PAD + 2 * (PAD * PAD + PAD)
                        + PAD * INPUT_SIZE + INPUT_SIZE)
    bytes_accessed = Bp * INPUT_SIZE * (x.dtype.itemsize + 4) + weight_bytes

    out = pl.pallas_call(
        csmodule_kernel,
        out_shape=jax.ShapeDtypeStruct((Bp, INPUT_SIZE), jnp.float32),
        grid=grid,
        in_specs=[
            row_spec(INPUT_SIZE),                               # x tile
            whole((INPUT_SIZE, PAD)), whole((1, PAD)),          # encoder
            whole((PAD, PAD)),        whole((1, PAD)),          # decoder[0]
            whole((PAD, PAD)),        whole((1, PAD)),          # decoder[2]
            whole((PAD, INPUT_SIZE)), whole((1, INPUT_SIZE)),   # decoder[4]
        ],
        out_specs=row_spec(INPUT_SIZE),
        compiler_params=pltpu.CompilerParams(
            dimension_semantics=("parallel",)),
        cost_estimate=pl.CostEstimate(
            flops=flops,
            transcendentals=Bp * 2 * PAD,
            bytes_accessed=bytes_accessed),
    )(x,
      kparams['weT'], kparams['be'],
      kparams['w1T'], kparams['b1'],
      kparams['w2T'], kparams['b2'],
      kparams['w3T'], kparams['b3'])

    if Bp != B:
        out = out[:B]
    return out


csmodule_forward_jit = jax.jit(csmodule_forward)


# ---------------------------------------------------------------------------
# Parameter init (PyTorch nn.Linear default uniform bounds), stored
# pre-transposed (x @ W^T form). `pad_params` zero-pads hidden dims to 128;
# the padding is exact (padded bias=0, tanh(0)=0, padded weight rows=0).
# ---------------------------------------------------------------------------
def init_params(key):
    ks = jax.random.split(key, 8)
    u = lambda k, shape, b: jax.random.uniform(k, shape, jnp.float32, -b, b)
    p = {}
    be = 1.0 / np.sqrt(INPUT_SIZE)
    p['weT'] = u(ks[0], (INPUT_SIZE, E_NODE), be)   # encoder weight^T
    p['be'] = u(ks[1], (1, E_NODE), be)
    b1 = 1.0 / np.sqrt(E_NODE)
    p['w1T'] = u(ks[2], (E_NODE, HID), b1)          # decoder[0] weight^T
    p['b1'] = u(ks[3], (1, HID), b1)
    b2 = 1.0 / np.sqrt(HID)
    p['w2T'] = u(ks[4], (HID, E_NODE), b2)          # decoder[2] weight^T
    p['b2'] = u(ks[5], (1, E_NODE), b2)
    b3 = 1.0 / np.sqrt(E_NODE)
    p['w3T'] = u(ks[6], (E_NODE, INPUT_SIZE), b3)   # decoder[4] weight^T
    p['b3'] = u(ks[7], (1, INPUT_SIZE), b3)
    return p


def pad_params(p):
    def pad2(a, rows, cols):
        r, c = a.shape
        return jnp.pad(a, ((0, rows - r), (0, cols - c)))
    return {
        'weT': pad2(p['weT'], INPUT_SIZE, PAD),
        'be':  pad2(p['be'], 1, PAD),
        'w1T': pad2(p['w1T'], PAD, PAD),
        'b1':  pad2(p['b1'], 1, PAD),
        'w2T': pad2(p['w2T'], PAD, PAD),
        'b2':  pad2(p['b2'], 1, PAD),
        'w3T': pad2(p['w3T'], PAD, INPUT_SIZE),
        'b3':  p['b3'],
    }


# Pure-jnp reference (unpadded params) for correctness checking.
def csmodule_reference(x, p):
    x = x.astype(jnp.float32)
    e = x @ p['weT'] + p['be']
    h = jnp.tanh(e @ p['w1T'] + p['b1'])
    h = jnp.tanh(h @ p['w2T'] + p['b2'])
    return h @ p['w3T'] + p['b3']


if __name__ == "__main__":
    key = jax.random.PRNGKey(0)
    k_x, k_p = jax.random.split(key)
    B = 4
    x = jax.random.normal(k_x, (B, INPUT_SIZE), dtype=jnp.float32)   # (4, 945)

    params = init_params(k_p)          # logical (unpadded) params -> reference
    kernel_params = pad_params(params)  # lane-aligned params -> kernel

    out = csmodule_forward_jit(x, kernel_params)
    jax.block_until_ready(out)

    ref = csmodule_reference(x, params)
    assert out.shape == (B, INPUT_SIZE)
    np.testing.assert_allclose(np.asarray(out), np.asarray(ref), rtol=2e-5, atol=2e-5)
    print("KERNEL_OK")
</pallas_src>

<mosaic_0001>
module attributes {stable_mosaic.version = 11 : i64} {
  func.func @csmodule_kernel(%arg0: i32, %arg1: memref<8x945xf32, #tpu.memory_space<vmem>>, %arg2: memref<945x128xf32, #tpu.memory_space<vmem>>, %arg3: memref<1x128xf32, #tpu.memory_space<vmem>>, %arg4: memref<128x128xf32, #tpu.memory_space<vmem>>, %arg5: memref<1x128xf32, #tpu.memory_space<vmem>>, %arg6: memref<128x128xf32, #tpu.memory_space<vmem>>, %arg7: memref<1x128xf32, #tpu.memory_space<vmem>>, %arg8: memref<128x945xf32, #tpu.memory_space<vmem>>, %arg9: memref<1x945xf32, #tpu.memory_space<vmem>>, %arg10: memref<8x945xf32, #tpu.memory_space<vmem>>) attributes {dimension_semantics = [#tpu.dimension_semantics<parallel>], iteration_bounds = array<i64: 1>, scalar_prefetch = 0 : i64, scratch_operands = 0 : i64, tpu.core_type = #tpu.core_type<tc>, window_params = [{transform_indices = @transform_0, window_bounds = array<i64: 8, 945>}, {pipeline_mode = #tpu.pipeline_mode<synchronous>, transform_indices = @transform_1, window_bounds = array<i64: 945, 128>}, {pipeline_mode = #tpu.pipeline_mode<synchronous>, transform_indices = @transform_2, window_bounds = array<i64: 1, 128>}, {pipeline_mode = #tpu.pipeline_mode<synchronous>, transform_indices = @transform_3, window_bounds = array<i64: 128, 128>}, {pipeline_mode = #tpu.pipeline_mode<synchronous>, transform_indices = @transform_4, window_bounds = array<i64: 1, 128>}, {pipeline_mode = #tpu.pipeline_mode<synchronous>, transform_indices = @transform_5, window_bounds = array<i64: 128, 128>}, {pipeline_mode = #tpu.pipeline_mode<synchronous>, transform_indices = @transform_6, window_bounds = array<i64: 1, 128>}, {pipeline_mode = #tpu.pipeline_mode<synchronous>, transform_indices = @transform_7, window_bounds = array<i64: 128, 945>}, {pipeline_mode = #tpu.pipeline_mode<synchronous>, transform_indices = @transform_8, window_bounds = array<i64: 1, 945>}, {transform_indices = @transform_9, window_bounds = array<i64: 8, 945>}]} {
    %c0 = arith.constant 0 : index
    %c0_0 = arith.constant 0 : index
    %0 = vector.load %arg1[%c0, %c0_0] : memref<8x945xf32, #tpu.memory_space<vmem>>, vector<8x945xf32>
    %c0_1 = arith.constant 0 : index
    %c0_2 = arith.constant 0 : index
    %1 = vector.load %arg2[%c0_1, %c0_2] : memref<945x128xf32, #tpu.memory_space<vmem>>, vector<945x128xf32>
    %cst = arith.constant dense<0.000000e+00> : vector<8x128xf32>
    %2 = tpu.matmul %0, %1, %cst {dimension_numbers = #tpu.dot_dimension_numbers<[1], [0], [0], [1], [0, 0, 1, 1], [], []>} : vector<8x945xf32>, vector<945x128xf32>, vector<8x128xf32> -> vector<8x128xf32>
    %c0_3 = arith.constant 0 : index
    %c0_4 = arith.constant 0 : index
    %3 = vector.load %arg3[%c0_3, %c0_4] : memref<1x128xf32, #tpu.memory_space<vmem>>, vector<1x128xf32>
    %4 = vector.broadcast %3 : vector<1x128xf32> to vector<8x128xf32>
    %5 = arith.addf %2, %4 : vector<8x128xf32>
    %c0_5 = arith.constant 0 : index
    %c0_6 = arith.constant 0 : index
    %6 = vector.load %arg4[%c0_5, %c0_6] : memref<128x128xf32, #tpu.memory_space<vmem>>, vector<128x128xf32>
    %cst_7 = arith.constant dense<0.000000e+00> : vector<8x128xf32>
    %7 = tpu.matmul %5, %6, %cst_7 {dimension_numbers = #tpu.dot_dimension_numbers<[1], [0], [0], [1], [0, 0, 1, 1], [], []>} : vector<8x128xf32>, vector<128x128xf32>, vector<8x128xf32> -> vector<8x128xf32>
    %c0_8 = arith.constant 0 : index
    %c0_9 = arith.constant 0 : index
    %8 = vector.load %arg5[%c0_8, %c0_9] : memref<1x128xf32, #tpu.memory_space<vmem>>, vector<1x128xf32>
    %9 = vector.broadcast %8 : vector<1x128xf32> to vector<8x128xf32>
    %10 = arith.addf %7, %9 : vector<8x128xf32>
    %11 = math.tanh %10 : vector<8x128xf32>
    %c0_10 = arith.constant 0 : index
    %c0_11 = arith.constant 0 : index
    %12 = vector.load %arg6[%c0_10, %c0_11] : memref<128x128xf32, #tpu.memory_space<vmem>>, vector<128x128xf32>
    %cst_12 = arith.constant dense<0.000000e+00> : vector<8x128xf32>
    %13 = tpu.matmul %11, %12, %cst_12 {dimension_numbers = #tpu.dot_dimension_numbers<[1], [0], [0], [1], [0, 0, 1, 1], [], []>} : vector<8x128xf32>, vector<128x128xf32>, vector<8x128xf32> -> vector<8x128xf32>
    %c0_13 = arith.constant 0 : index
    %c0_14 = arith.constant 0 : index
    %14 = vector.load %arg7[%c0_13, %c0_14] : memref<1x128xf32, #tpu.memory_space<vmem>>, vector<1x128xf32>
    %15 = vector.broadcast %14 : vector<1x128xf32> to vector<8x128xf32>
    %16 = arith.addf %13, %15 : vector<8x128xf32>
    %17 = math.tanh %16 : vector<8x128xf32>
    %c0_15 = arith.constant 0 : index
    %c0_16 = arith.constant 0 : index
    %18 = vector.load %arg8[%c0_15, %c0_16] : memref<128x945xf32, #tpu.memory_space<vmem>>, vector<128x945xf32>
    %cst_17 = arith.constant dense<0.000000e+00> : vector<8x945xf32>
    %19 = tpu.matmul %17, %18, %cst_17 {dimension_numbers = #tpu.dot_dimension_numbers<[1], [0], [0], [1], [0, 0, 1, 1], [], []>} : vector<8x128xf32>, vector<128x945xf32>, vector<8x945xf32> -> vector<8x945xf32>
    %c0_18 = arith.constant 0 : index
    %c0_19 = arith.constant 0 : index
    %20 = vector.load %arg9[%c0_18, %c0_19] : memref<1x945xf32, #tpu.memory_space<vmem>>, vector<1x945xf32>
    %21 = vector.broadcast %20 : vector<1x945xf32> to vector<8x945xf32>
    %22 = arith.addf %19, %21 : vector<8x945xf32>
    %c0_20 = arith.constant 0 : index
    %c0_21 = arith.constant 0 : index
    %23 = vector.load %arg10[%c0_20, %c0_21] : memref<8x945xf32, #tpu.memory_space<vmem>>, vector<8x945xf32>
    tpu.vector_store %arg10[%c0_20, %c0_21], %22 {strides = array<i32>} : memref<8x945xf32, #tpu.memory_space<vmem>>, vector<8x945xf32>,
    return
  }
  func.func @transform_0(%arg0: i32) -> (i32, i32) {
    %c0_i32 = arith.constant 0 : i32
    %c0_i32_0 = arith.constant 0 : i32
    return %arg0, %c0_i32 : i32, i32
  }
  func.func @transform_1(%arg0: i32) -> (i32, i32) {
    %c0_i32 = arith.constant 0 : i32
    %c0_i32_0 = arith.constant 0 : i32
    %c0_i32_1 = arith.constant 0 : i32
    return %c0_i32, %c0_i32_0 : i32, i32
  }
  func.func @transform_2(%arg0: i32) -> (i32, i32) {
    %c0_i32 = arith.constant 0 : i32
    %c0_i32_0 = arith.constant 0 : i32
    %c0_i32_1 = arith.constant 0 : i32
    return %c0_i32, %c0_i32_0 : i32, i32
  }
  func.func @transform_3(%arg0: i32) -> (i32, i32) {
    %c0_i32 = arith.constant 0 : i32
    %c0_i32_0 = arith.constant 0 : i32
    %c0_i32_1 = arith.constant 0 : i32
    return %c0_i32, %c0_i32_0 : i32, i32
  }
  func.func @transform_4(%arg0: i32) -> (i32, i32) {
    %c0_i32 = arith.constant 0 : i32
    %c0_i32_0 = arith.constant 0 : i32
    %c0_i32_1 = arith.constant 0 : i32
    return %c0_i32, %c0_i32_0 : i32, i32
  }
  func.func @transform_5(%arg0: i32) -> (i32, i32) {
    %c0_i32 = arith.constant 0 : i32
    %c0_i32_0 = arith.constant 0 : i32
    %c0_i32_1 = arith.constant 0 : i32
    return %c0_i32, %c0_i32_0 : i32, i32
  }
  func.func @transform_6(%arg0: i32) -> (i32, i32) {
    %c0_i32 = arith.constant 0 : i32
    %c0_i32_0 = arith.constant 0 : i32
    %c0_i32_1 = arith.constant 0 : i32
    return %c0_i32, %c0_i32_0 : i32, i32
  }
  func.func @transform_7(%arg0: i32) -> (i32, i32) {
    %c0_i32 = arith.constant 0 : i32
    %c0_i32_0 = arith.constant 0 : i32
    %c0_i32_1 = arith.constant 0 : i32
    return %c0_i32, %c0_i32_0 : i32, i32
  }
  func.func @transform_8(%arg0: i32) -> (i32, i32) {
    %c0_i32 = arith.constant 0 : i32
    %c0_i32_0 = arith.constant 0 : i32
    %c0_i32_1 = arith.constant 0 : i32
    return %c0_i32, %c0_i32_0 : i32, i32
  }
  func.func @transform_9(%arg0: i32) -> (i32, i32) {
    %c0_i32 = arith.constant 0 : i32
    %c0_i32_0 = arith.constant 0 : i32
    return %arg0, %c0_i32 : i32, i32
  }
}

</mosaic_0001>

<bundles_post_ra>
// kernel: csmodule_forward.1
= control target key start
LH: loop header
LB: loop body
LE: loop exit
PB: predicated region body
PF: predicated region fallthrough
CT: control target
= control target key end

     0   :  { %vm166_vm0 = vcmask 400384   ;;  %vm170_vm1 = vcmask 1040384   ;;  %vm1636_vm2 = vmmov 0   ;;  %s2626_s1 = inlined_call_operand.vmem [shape: f32[945,128], index: 1, kind: input, shape index: {}]   ;;  %s2627_s0 = inlined_call_operand.vmem [shape: f32[8,945], index: 0, kind: input, shape index: {}]   ;;  %s2628_s3 = inlined_call_operand.vmem [shape: f32[128,128], index: 3, kind: input, shape index: {}]   ;;  %s2629_s5 = inlined_call_operand.vmem [shape: f32[128,128], index: 5, kind: input, shape index: {}]   ;;  %s2630_s2 = inlined_call_operand.vmem [shape: f32[1,128], index: 2, kind: input, shape index: {}]   ;;  %s2631_s7 = inlined_call_operand.vmem [shape: f32[128,945], index: 7, kind: input, shape index: {}]   ;;  %s2632_s4 = inlined_call_operand.vmem [shape: f32[1,128], index: 4, kind: input, shape index: {}]   ;;  %s2633_s6 = inlined_call_operand.vmem [shape: f32[1,128], index: 6, kind: input, shape index: {}]   ;;  %s2634_s8 = inlined_call_operand.vmem [shape: f32[1,945], index: 8, kind: input, shape index: {}]   ;;  %s2635_s9 = inlined_call_operand.vmem [shape: f32[8,945], index: 9, kind: output, shape index: {}]  }
   0x1   :  { %v56_v0 = vld [vmem:[%s2626_s1 + $0x80] sm:$0xff]  ;;  %v57_v1 = vld [vmem:[%s2626_s1 + $0x88] sm:$0xff]  ;;  %v58_v11 = vld [vmem:[%s2626_s1 + $0x90] sm:$0xff] }
   0x2   :  { %v88_v2 = vld [vmem:[%s2626_s1 + $0x180] sm:$0xff]  ;;  %v1322_v3 = vpack.c.bf16 %v57_v1, %v56_v0  ;;  %v89_v4 = vld [vmem:[%s2626_s1 + $0x188] sm:$0xff]  ;;  %v59_v13 = vld [vmem:[%s2626_s1 + $0x98] sm:$0xff] }
   0x3   :  { %v40_v5 = vld [vmem:[%s2626_s1] sm:$0xff]  ;;  %v41_v6 = vld [vmem:[%s2626_s1 + $0x8] sm:$0xff]  ;;  %v1354_v7 = vpack.c.bf16 %v89_v4, %v88_v2  ;;  %v90_v14 = vld [vmem:[%s2626_s1 + $0x190] sm:$0xff]  ;;  %v1326_v16 = vpack.c.bf16 %v59_v13, %v58_v11 }
   0x4   :  { %v1324_v8 = vpack.c.bf16 %v41_v6, %v40_v5  ;;  %v72_v9 = vld [vmem:[%s2626_s1 + $0x100] sm:$0xff]  ;;  %v73_v10 = vld [vmem:[%s2626_s1 + $0x108] sm:$0xff]  ;;  %1323 = vmatprep.subr.bf16.mxu0 %v1322_v3  ;;  %v91_v15 = vld [vmem:[%s2626_s1 + $0x198] sm:$0xff] }
   0x5   :  { %v1356_v12 = vpack.c.bf16 %v73_v10, %v72_v9  ;;  %1355 = vmatprep.subr.bf16.mxu1 %v1354_v7  ;;  %v1358_v17 = vpack.c.bf16 %v91_v15, %v90_v14  ;;  %v42_v18 = vld [vmem:[%s2626_s1 + $0x10] sm:$0xff]  ;;  %v43_v19 = vld [vmem:[%s2626_s1 + $0x18] sm:$0xff]  ;;  %v60_v23 = vld [vmem:[%s2626_s1 + $0xa0] sm:$0xff] }
   0x6   :  { %1325 = vmatpush3.bf16.msra.mxu0 %v1324_v8  ;;  %v74_v20 = vld [vmem:[%s2626_s1 + $0x110] sm:$0xff]  ;;  %v1328_v21 = vpack.c.bf16 %v43_v19, %v42_v18  ;;  %v75_v22 = vld [vmem:[%s2626_s1 + $0x118] sm:$0xff]  ;;  %v61_v24 = vld [vmem:[%s2626_s1 + $0xa8] sm:$0xff] }
   0x7   :  { %1357 = vmatpush3.bf16.msra.mxu1 %v1356_v12  ;;  %1327 = vmatprep.subr.bf16.mxu0 %v1326_v16  ;;  %v1360_v25 = vpack.c.bf16 %v75_v22, %v74_v20  ;;  %v1330_v26 = vpack.c.bf16 %v61_v24, %v60_v23  ;;  %v92_v27 = vld [vmem:[%s2626_s1 + $0x1a0] sm:$0xff]  ;;  %v93_v28 = vld [vmem:[%s2626_s1 + $0x1a8] sm:$0xff]  ;;  %v62_v35 = vld [vmem:[%s2626_s1 + $0xb0] sm:$0xff] }
   0x8   :  { %1359 = vmatprep.subr.bf16.mxu1 %v1358_v17  ;;  %v44_v29 = vld [vmem:[%s2626_s1 + $0x20] sm:$0xff]  ;;  %v1362_v30 = vpack.c.bf16 %v93_v28, %v92_v27  ;;  %v45_v31 = vld [vmem:[%s2626_s1 + $0x28] sm:$0xff]  ;;  %v63_v36 = vld [vmem:[%s2626_s1 + $0xb8] sm:$0xff] }
   0x9   :  { %v76_v32 = vld [vmem:[%s2626_s1 + $0x120] sm:$0xff]  ;;  %v77_v33 = vld [vmem:[%s2626_s1 + $0x128] sm:$0xff]  ;;  %v1332_v34 = vpack.c.bf16 %v45_v31, %v44_v29  ;;  %v94_v37 = vld [vmem:[%s2626_s1 + $0x1b0] sm:$0xff]  ;;  %v1334_v39 = vpack.c.bf16 %v63_v36, %v62_v35 }
   0xa   :  { %1329 = vmatpush3.bf16.msra.mxu0 %v1328_v21  ;;  %v1364_v38 = vpack.c.bf16 %v77_v33, %v76_v32  ;;  %v95_v40 = vld [vmem:[%s2626_s1 + $0x1b8] sm:$0xff]  ;;  %v46_v41 = vld [vmem:[%s2626_s1 + $0x30] sm:$0xff]  ;;  %v64_v46 = vld [vmem:[%s2626_s1 + $0xc0] sm:$0xff] }
   0xb   :  { %1361 = vmatpush3.bf16.msra.mxu1 %v1360_v25  ;;  %1331 = vmatprep.subr.bf16.mxu0 %v1330_v26  ;;  %v47_v42 = vld [vmem:[%s2626_s1 + $0x38] sm:$0xff]  ;;  %v1366_v43 = vpack.c.bf16 %v95_v40, %v94_v37  ;;  %v78_v44 = vld [vmem:[%s2626_s1 + $0x130] sm:$0xff]  ;;  %v65_v47 = vld [vmem:[%s2626_s1 + $0xc8] sm:$0xff] }
   0xc   :  { %1363 = vmatprep.subr.bf16.mxu1 %v1362_v30  ;;  %v79_v45 = vld [vmem:[%s2626_s1 + $0x138] sm:$0xff]  ;;  %v96_v48 = vld [vmem:[%s2626_s1 + $0x1c0] sm:$0xff]  ;;  %v97_v49 = vld [vmem:[%s2626_s1 + $0x1c8] sm:$0xff]  ;;  %v1336_v50 = vpack.c.bf16 %v47_v42, %v46_v41  ;;  %v1338_v52 = vpack.c.bf16 %v65_v47, %v64_v46 }
   0xd   :  { %v1368_v51 = vpack.c.bf16 %v79_v45, %v78_v44  ;;  %v48_v53 = vld [vmem:[%s2626_s1 + $0x40] sm:$0xff]  ;;  %v49_v54 = vld [vmem:[%s2626_s1 + $0x48] sm:$0xff]  ;;  %v1370_v56 = vpack.c.bf16 %v97_v49, %v96_v48  ;;  %v66_v58 = vld [vmem:[%s2626_s1 + $0xd0] sm:$0xff] }
   0xe   :  { %1333 = vmatpush3.bf16.msra.mxu0 %v1332_v34  ;;  %v80_v55 = vld [vmem:[%s2626_s1 + $0x140] sm:$0xff]  ;;  %v81_v57 = vld [vmem:[%s2626_s1 + $0x148] sm:$0xff]  ;;  %v67_v59 = vld [vmem:[%s2626_s1 + $0xd8] sm:$0xff]  ;;  %v1340_v62 = vpack.c.bf16 %v49_v54, %v48_v53 }
   0xf   :  { %1365 = vmatpush3.bf16.msra.mxu1 %v1364_v38  ;;  %1335 = vmatprep.subr.bf16.mxu0 %v1334_v39  ;;  %v98_v60 = vld [vmem:[%s2626_s1 + $0x1d0] sm:$0xff]  ;;  %v99_v61 = vld [vmem:[%s2626_s1 + $0x1d8] sm:$0xff]  ;;  %v1372_v63 = vpack.c.bf16 %v81_v57, %v80_v55  ;;  %v1342_v0 = vpack.c.bf16 %v67_v59, %v66_v58  ;;  %v68_v6 = vld [vmem:[%s2626_s1 + $0xe0] sm:$0xff] }
  0x10   :  { %1367 = vmatprep.subr.bf16.mxu1 %v1366_v43  ;;  %v50_v1 = vld [vmem:[%s2626_s1 + $0x50] sm:$0xff]  ;;  %v51_v2 = vld [vmem:[%s2626_s1 + $0x58] sm:$0xff]  ;;  %v1374_v4 = vpack.c.bf16 %v99_v61, %v98_v60  ;;  %v69_v7 = vld [vmem:[%s2626_s1 + $0xe8] sm:$0xff] }
  0x11   :  { %v82_v3 = vld [vmem:[%s2626_s1 + $0x150] sm:$0xff]  ;;  %v83_v5 = vld [vmem:[%s2626_s1 + $0x158] sm:$0xff]  ;;  %v100_v8 = vld [vmem:[%s2626_s1 + $0x1e0] sm:$0xff]  ;;  %v1344_v10 = vpack.c.bf16 %v51_v2, %v50_v1  ;;  %v1346_v14 = vpack.c.bf16 %v69_v7, %v68_v6 }
  0x12   :  { %1337 = vmatpush3.bf16.msra.mxu0 %v1336_v50  ;;  %v101_v9 = vld [vmem:[%s2626_s1 + $0x1e8] sm:$0xff]  ;;  %v52_v11 = vld [vmem:[%s2626_s1 + $0x60] sm:$0xff]  ;;  %v1376_v13 = vpack.c.bf16 %v83_v5, %v82_v3  ;;  %v35_v17 = vld [vmem:[%s2627_s0 + $0x18] sm:$0xff] }
  0x13   :  { %1369 = vmatpush3.bf16.msra.mxu1 %v1368_v51  ;;  %1339 = vmatprep.subr.bf16.mxu0 %v1338_v52  ;;  %v53_v12 = vld [vmem:[%s2626_s1 + $0x68] sm:$0xff]  ;;  %v84_v15 = vld [vmem:[%s2626_s1 + $0x160] sm:$0xff]  ;;  %v1378_v18 = vpack.c.bf16 %v101_v9, %v100_v8  ;;  %v70_v20 = vld [vmem:[%s2626_s1 + $0xf0] sm:$0xff]  ;;  %v1634_v51 = vmov 0.0|0.0  }
  0x14   :  { %1371 = vmatprep.subr.bf16.mxu1 %v1370_v56  ;;  %v33_v16 = vld [vmem:[%s2627_s0 + $0x8] sm:$0xff]  ;;  %v71_v21 = vld [vmem:[%s2626_s1 + $0xf8] sm:$0xff]  ;;  %v102_v22 = vld [vmem:[%s2626_s1 + $0x1f0] sm:$0xff]  ;;  %308 = vmatprep.mubr.f32.mxu1 %v35_v17  ;;  %v1348_v24 = vpack.c.bf16 %v53_v12, %v52_v11 }
  0x15   :  { %v85_v19 = vld [vmem:[%s2626_s1 + $0x168] sm:$0xff]  ;;  %238 = vmatprep.mubr.f32.mxu0 %v33_v16  ;;  %v103_v23 = vld [vmem:[%s2626_s1 + $0x1f8] sm:$0xff]  ;;  %v1350_v26 = vpack.c.bf16 %v71_v21, %v70_v20  ;;  %v54_v27 = vld [vmem:[%s2626_s1 + $0x70] sm:$0xff] }
  0x16   :  { %1341 = vmatpush3.bf16.msra.mxu0 %v1340_v62  ;;  %v1380_v25 = vpack.c.bf16 %v85_v19, %v84_v15  ;;  %v55_v28 = vld [vmem:[%s2626_s1 + $0x78] sm:$0xff]  ;;  %v86_v29 = vld [vmem:[%s2626_s1 + $0x170] sm:$0xff]  ;;  %v1382_v30 = vpack.c.bf16 %v103_v23, %v102_v22  ;;  %v120_v32 = vld [vmem:[%s2626_s1 + $0x280] sm:$0xff] }
  0x17   :  { %1373 = vmatpush3.bf16.msra.mxu1 %v1372_v63  ;;  %1343 = vmatprep.subr.bf16.mxu0 %v1342_v0  ;;  %v87_v31 = vld [vmem:[%s2626_s1 + $0x178] sm:$0xff]  ;;  %v121_v33 = vld [vmem:[%s2626_s1 + $0x288] sm:$0xff]  ;;  %v1352_v34 = vpack.c.bf16 %v55_v28, %v54_v27  ;;  %v104_v37 = vld [vmem:[%s2626_s1 + $0x200] sm:$0xff] }
  0x18   :  { %1375 = vmatprep.subr.bf16.mxu1 %v1374_v4  ;;  %v1384_v35 = vpack.c.bf16 %v87_v31, %v86_v29  ;;  %v1386_v36 = vpack.c.bf16 %v121_v33, %v120_v32  ;;  %v105_v38 = vld [vmem:[%s2626_s1 + $0x208] sm:$0xff]  ;;  %v136_v39 = vld [vmem:[%s2626_s1 + $0x300] sm:$0xff]  ;;  %v122_v41 = vld [vmem:[%s2626_s1 + $0x290] sm:$0xff] }
  0x19   :  { %v137_v40 = vld [vmem:[%s2626_s1 + $0x308] sm:$0xff]  ;;  %v123_v42 = vld [vmem:[%s2626_s1 + $0x298] sm:$0xff]  ;;  %v32_v43 = vld [vmem:[%s2627_s0] sm:$0xff]  ;;  %v1388_v45 = vpack.c.bf16 %v105_v38, %v104_v37 }
  0x1a   :  { %1345 = vmatpush3.bf16.msra.mxu0 %v1344_v10  ;;  %v34_v44 = vld [vmem:[%s2627_s0 + $0x10] sm:$0xff]  ;;  %v1419_v46 = vpack.c.bf16 %v137_v40, %v136_v39  ;;  %v1390_v47 = vpack.c.bf16 %v123_v42, %v122_v41  ;;  %v107_v49 = vld [vmem:[%s2626_s1 + $0x218] sm:$0xff]  ;;  %v124_v53 = vld [vmem:[%s2626_s1 + $0x2a0] sm:$0xff] }
  0x1b   :  { %1377 = vmatpush3.bf16.msra.mxu1 %v1376_v13  ;;  %1347 = vmatprep.subr.bf16.mxu0 %v1346_v14  ;;  %v106_v48 = vld [vmem:[%s2626_s1 + $0x210] sm:$0xff]  ;;  %v139_v52 = vld [vmem:[%s2626_s1 + $0x318] sm:$0xff]  ;;  %v125_v54 = vld [vmem:[%s2626_s1 + $0x2a8] sm:$0xff] }
  0x1c   :  { %1379 = vmatprep.subr.bf16.mxu1 %v1378_v18  ;;  %v138_v50 = vld [vmem:[%s2626_s1 + $0x310] sm:$0xff]  ;;  %v1392_v55 = vpack.c.bf16 %v107_v49, %v106_v48  ;;  %v108_v56 = vld [vmem:[%s2626_s1 + $0x220] sm:$0xff]  ;;  %v1394_v58 = vpack.c.bf16 %v125_v54, %v124_v53  ;;  %v109_v59 = vld [vmem:[%s2626_s1 + $0x228] sm:$0xff] }
  0x1d   :  { %v1422_v57 = vpack.c.bf16 %v139_v52, %v138_v50  ;;  %v140_v60 = vld [vmem:[%s2626_s1 + $0x320] sm:$0xff]  ;;  %v141_v61 = vld [vmem:[%s2626_s1 + $0x328] sm:$0xff]  ;;  %v126_v62 = vld [vmem:[%s2626_s1 + $0x2b0] sm:$0xff]  ;;  %v1396_v1 = vpack.c.bf16 %v109_v59, %v108_v56 }
  0x1e   :  { %1349 = vmatpush3.bf16.msra.mxu0 %v1348_v24  ;;  %v127_v63 = vld [vmem:[%s2626_s1 + $0x2b8] sm:$0xff]  ;;  %v37_v0 = vld [vmem:[%s2627_s0 + $0x28] sm:$0xff]  ;;  %v110_v2 = vld [vmem:[%s2626_s1 + $0x230] sm:$0xff]  ;;  %v1425_v3 = vpack.c.bf16 %v141_v61, %v140_v60 }
  0x1f   :  { %1381 = vmatpush3.bf16.msra.mxu1 %v1380_v25  ;;  %1351 = vmatprep.subr.bf16.mxu0 %v1350_v26  ;;  %v1398_v4 = vpack.c.bf16 %v127_v63, %v126_v62  ;;  %v111_v5 = vld [vmem:[%s2626_s1 + $0x238] sm:$0xff]  ;;  %v142_v6 = vld [vmem:[%s2626_s1 + $0x330] sm:$0xff]  ;;  %v128_v9 = vld [vmem:[%s2626_s1 + $0x2c0] sm:$0xff] }
  0x20   :  { %1383 = vmatprep.subr.bf16.mxu1 %v1382_v30  ;;  %v39_v7 = vld [vmem:[%s2627_s0 + $0x38] sm:$0xff]  ;;  %v129_v10 = vld [vmem:[%s2626_s1 + $0x2c8] sm:$0xff]  ;;  %v1400_v11 = vpack.c.bf16 %v111_v5, %v110_v2  ;;  %v112_v14 = vld [vmem:[%s2626_s1 + $0x240] sm:$0xff] }
  0x21   :  { %v143_v8 = vld [vmem:[%s2626_s1 + $0x338] sm:$0xff]  ;;  %v1402_v13 = vpack.c.bf16 %v129_v10, %v128_v9  ;;  %v113_v15 = vld [vmem:[%s2626_s1 + $0x248] sm:$0xff]  ;;  %v144_v16 = vld [vmem:[%s2626_s1 + $0x340] sm:$0xff] }
  0x22   :  { %1353 = vmatpush3.bf16.msra.mxu0 %v1352_v34  ;;  %v1428_v12 = vpack.c.bf16 %v143_v8, %v142_v6  ;;  %v145_v17 = vld [vmem:[%s2626_s1 + $0x348] sm:$0xff]  ;;  %v130_v18 = vld [vmem:[%s2626_s1 + $0x2d0] sm:$0xff]  ;;  %v131_v19 = vld [vmem:[%s2626_s1 + $0x2d8] sm:$0xff]  ;;  %v1404_v20 = vpack.c.bf16 %v113_v15, %v112_v14 }
  0x23   :  { %1385 = vmatpush3.bf16.msra.mxu1 %v1384_v35  ;;  %1387 = vmatprep.subr.bf16.mxu0 %v1386_v36  ;;  %v1431_v21 = vpack.c.bf16 %v145_v17, %v144_v16  ;;  %v1406_v22 = vpack.c.bf16 %v131_v19, %v130_v18  ;;  %v114_v23 = vld [vmem:[%s2626_s1 + $0x250] sm:$0xff]  ;;  %v115_v24 = vld [vmem:[%s2626_s1 + $0x258] sm:$0xff]  ;;  %v132_v27 = vld [vmem:[%s2626_s1 + $0x2e0] sm:$0xff] }
  0x24   :  { %1418 = vmatprep.subr.bf16.mxu1 %v1634_v51  ;;  %v146_v25 = vld [vmem:[%s2626_s1 + $0x350] sm:$0xff]  ;;  %v147_v26 = vld [vmem:[%s2626_s1 + $0x358] sm:$0xff]  ;;  %v133_v28 = vld [vmem:[%s2626_s1 + $0x2e8] sm:$0xff]  ;;  %v1408_v29 = vpack.c.bf16 %v115_v24, %v114_v23 }
  0x25   :  { %239 = vmatmul.mubr.f32.vlgmr.msra.gmra.mrb[0].mxu0 %v32_v43  ;;  %v1434_v30 = vpack.c.bf16 %v147_v26, %v146_v25  ;;  %v1410_v31 = vpack.c.bf16 %v133_v28, %v132_v27  ;;  %v116_v32 = vld [vmem:[%s2626_s1 + $0x260] sm:$0xff]  ;;  %v117_v33 = vld [vmem:[%s2626_s1 + $0x268] sm:$0xff]  ;;  %v134_v36 = vld [vmem:[%s2626_s1 + $0x2f0] sm:$0xff] }
  0x26   :  { %309 = vmatmul.mubr.f32.vlgmr.msra.gmra.mrb[0].mxu1 %v34_v44  ;;  %1389 = vmatpush3.bf16.msra.mxu0 %v1388_v45  ;;  %v148_v34 = vld [vmem:[%s2626_s1 + $0x360] sm:$0xff]  ;;  %v149_v35 = vld [vmem:[%s2626_s1 + $0x368] sm:$0xff]  ;;  %v135_v37 = vld [vmem:[%s2626_s1 + $0x2f8] sm:$0xff]  ;;  %v1412_v38 = vpack.c.bf16 %v117_v33, %v116_v32 }
  0x27   :  { %1420 = vmatpush1.bf16.msra.mxu1 %v1419_v46  ;;  %1391 = vmatprep.subr.bf16.mxu0 %v1390_v47  ;;  %v1437_v39 = vpack.c.bf16 %v149_v35, %v148_v34  ;;  %v1414_v40 = vpack.c.bf16 %v135_v37, %v134_v36  ;;  %v118_v41 = vld [vmem:[%s2626_s1 + $0x270] sm:$0xff]  ;;  %v119_v42 = vld [vmem:[%s2626_s1 + $0x278] sm:$0xff]  ;;  %v152_v47 = vld [vmem:[%s2626_s1 + $0x380] sm:$0xff] }
  0x28   :  { %1421 = vmatprep.subr.bf16.mxu1 %v1634_v51  ;;  %378 = vmatprep.mubr.f32.mxu0 %v37_v0  ;;  %v150_v43 = vld [vmem:[%s2626_s1 + $0x370] sm:$0xff]  ;;  %v151_v44 = vld [vmem:[%s2626_s1 + $0x378] sm:$0xff]  ;;  %v1416_v45 = vpack.c.bf16 %v119_v42, %v118_v41  ;;  %v153_v48 = vld [vmem:[%s2626_s1 + $0x388] sm:$0xff] }
  0x29   :  { %1110 = vmatprep.mubr.msk.f32.mxu1 %vm166_vm0, %v39_v7  ;;  %v1440_v46 = vpack.c.bf16 %v151_v44, %v150_v43  ;;  %v36_v49 = vld [vmem:[%s2627_s0 + $0x20] sm:$0xff]  ;;  %v1443_v50 = vpack.c.bf16 %v153_v48, %v152_v47  ;;  %v154_v52 = vld [vmem:[%s2626_s1 + $0x390] sm:$0xff]  ;;  %v155_v53 = vld [vmem:[%s2626_s1 + $0x398] sm:$0xff] }
  0x2a   :  { %1393 = vmatpush3.bf16.msra.mxu0 %v1392_v55  ;;  %v1446_v54 = vpack.c.bf16 %v155_v53, %v154_v52  ;;  %v156_v55 = vld [vmem:[%s2626_s1 + $0x3a0] sm:$0xff]  ;;  %v157_v56 = vld [vmem:[%s2626_s1 + $0x3a8] sm:$0xff]  ;;  %v158_v59 = vld [vmem:[%s2626_s1 + $0x3b0] sm:$0x1] }
  0x2b   :  { %1423 = vmatpush1.bf16.msra.mxu1 %v1422_v57  ;;  %1395 = vmatprep.subr.bf16.mxu0 %v1394_v58  ;;  %v1449_v57 = vpack.c.bf16 %v157_v56, %v156_v55  ;;  %v1635_v58 = vmov 0.0   ;;  %v38_v60 = vld [vmem:[%s2627_s0 + $0x30] sm:$0xff]  ;;  %v454_v61 = vld [vmem:[%s2628_s3] sm:$0xff]  ;;  %v455_v62 = vld [vmem:[%s2628_s3 + $0x8] sm:$0xff] }
  0x2c   :  { %1424 = vmatprep.subr.bf16.mxu1 %v1634_v51  ;;  %v456_v63 = vld [vmem:[%s2628_s3 + $0x10] sm:$0xff]  ;;  %v1452_v0 = vpack.c.bf16 %v455_v62, %v454_v61  ;;  %v461_v7 = vld [vmem:[%s2628_s3 + $0x38] sm:$0xff]  ;;  %v462_v9 = vld [vmem:[%s2628_s3 + $0x40] sm:$0xff] }
  0x2d   :  { %v460_v6 = vld [vmem:[%s2628_s3 + $0x30] sm:$0xff]  ;;  %v463_v10 = vld [vmem:[%s2628_s3 + $0x48] sm:$0xff]  ;;  %v466_v15 = vld [vmem:[%s2628_s3 + $0x60] sm:$0xff] }
  0x2e   :  { %1397 = vmatpush3.bf16.msra.mxu0 %v1396_v1  ;;  %v457_v1 = vld [vmem:[%s2628_s3 + $0x18] sm:$0xff]  ;;  %v1461_v8 = vpack.c.bf16 %v461_v7, %v460_v6  ;;  %v467_v16 = vld [vmem:[%s2628_s3 + $0x68] sm:$0xff]  ;;  %v468_v18 = vld [vmem:[%s2628_s3 + $0x70] sm:$0xff] }
  0x2f   :  { %1426 = vmatpush1.bf16.msra.mxu1 %v1425_v3  ;;  %1399 = vmatprep.subr.bf16.mxu0 %v1398_v4  ;;  %v1455_v2 = vpack.c.bf16 %v457_v1, %v456_v63  ;;  %v458_v3 = vld [vmem:[%s2628_s3 + $0x20] sm:$0xff]  ;;  %v459_v4 = vld [vmem:[%s2628_s3 + $0x28] sm:$0xff]  ;;  %v1470_v17 = vpack.c.bf16 %v467_v16, %v466_v15  ;;  %v469_v19 = vld [vmem:[%s2628_s3 + $0x78] sm:$0xff] }
  0x30   :  { %1427 = vmatprep.subr.bf16.mxu1 %v1634_v51  ;;  %v1458_v5 = vpack.c.bf16 %v459_v4, %v458_v3  ;;  %v550_v23 = vld [vmem:[%s2629_s5 + $0x10] sm:$0xff]  ;;  %v551_v25 = vld [vmem:[%s2629_s5 + $0x18] sm:$0xff]  ;;  %v552_v27 = vld [vmem:[%s2629_s5 + $0x20] sm:$0xff] }
  0x31   :  { %v1479_v26 = vpack.c.bf16 %v551_v25, %v550_v23  ;;  %v553_v28 = vld [vmem:[%s2629_s5 + $0x28] sm:$0xff]  ;;  %v556_v33 = vld [vmem:[%s2629_s5 + $0x40] sm:$0xff]  ;;  %v558_v53 = vld [vmem:[%s2629_s5 + $0x50] sm:$0xff] }
  0x32   :  { %1401 = vmatpush3.bf16.msra.mxu0 %v1400_v11  ;;  %v1464_v11 = vpack.c.bf16 %v463_v10, %v462_v9  ;;  %v557_v34 = vld [vmem:[%s2629_s5 + $0x48] sm:$0xff]  ;;  %v560_v56 = vld [vmem:[%s2629_s5 + $0x60] sm:$0xff]  ;;  %v563_v61 = vld [vmem:[%s2629_s5 + $0x78] sm:$0xff] }
  0x33   :  { %1429 = vmatpush1.bf16.msra.mxu1 %v1428_v12  ;;  %1403 = vmatprep.subr.bf16.mxu0 %v1402_v13  ;;  %v464_v12 = vld [vmem:[%s2628_s3 + $0x50] sm:$0xff]  ;;  %v465_v13 = vld [vmem:[%s2628_s3 + $0x58] sm:$0xff]  ;;  %v1488_v35 = vpack.c.bf16 %v557_v34, %v556_v33  ;;  %v643_v63 = vld [vmem:[%s2631_s7 + $0x8] sm:$0xff] }
  0x34   :  { %1430 = vmatprep.subr.bf16.mxu1 %v1634_v51  ;;  %v1467_v14 = vpack.c.bf16 %v465_v13, %v464_v12  ;;  %v645_v1 = vld [vmem:[%s2631_s7 + $0x18] sm:$0xff]  ;;  %v650_v4 = vld [vmem:[%s2631_s7 + $0x40] sm:$0xff]  ;;  %v659_v7 = vld [vmem:[%s2631_s7 + $0x88] sm:$0xff] }
  0x35   :  { %v653_v3 = vld [vmem:[%s2631_s7 + $0x58] sm:$0xff]  ;;  %v658_v10 = vld [vmem:[%s2631_s7 + $0x80] sm:$0xff]  ;;  %v675_v13 = vld [vmem:[%s2631_s7 + $0x108] sm:$0xff] }
  0x36   :  { %1405 = vmatpush3.bf16.msra.mxu0 %v1404_v20  ;;  %v1473_v20 = vpack.c.bf16 %v469_v19, %v468_v18  ;;  %v674_v16 = vld [vmem:[%s2631_s7 + $0x100] sm:$0xff]  ;;  %v691_v19 = vld [vmem:[%s2631_s7 + $0x188] sm:$0xff] }
  0x37   :  { %1432 = vmatpush1.bf16.msra.mxu1 %v1431_v21  ;;  %1407 = vmatprep.subr.bf16.mxu0 %v1406_v22  ;;  %v548_v21 = vld [vmem:[%s2629_s5] sm:$0xff]  ;;  %v549_v22 = vld [vmem:[%s2629_s5 + $0x8] sm:$0xff] }
  0x38   :  { %1433 = vmatprep.subr.bf16.mxu1 %v1634_v51  ;;  %v1476_v24 = vpack.c.bf16 %v549_v22, %v548_v21  ;;  %v690_v22 = vld [vmem:[%s2631_s7 + $0x180] sm:$0xff]  ;;  %v707_v25 = vld [vmem:[%s2631_s7 + $0x208] sm:$0xff] }
  0x39   :  { %v698_v23 = vld [vmem:[%s2631_s7 + $0x1c0] sm:$0xff] }
  0x3a   :  { %1409 = vmatpush3.bf16.msra.mxu0 %v1408_v29  ;;  %v1482_v29 = vpack.c.bf16 %v553_v28, %v552_v27  ;;  %v706_v28 = vld [vmem:[%s2631_s7 + $0x200] sm:$0xff] }
  0x3b   :  { %1435 = vmatpush1.bf16.msra.mxu1 %v1434_v30  ;;  %1411 = vmatprep.subr.bf16.mxu0 %v1410_v31  ;;  %v554_v30 = vld [vmem:[%s2629_s5 + $0x30] sm:$0xff]  ;;  %v555_v31 = vld [vmem:[%s2629_s5 + $0x38] sm:$0xff] }
  0x3c   :  { %1436 = vmatprep.subr.bf16.mxu1 %v1634_v51  ;;  %v1485_v32 = vpack.c.bf16 %v555_v31, %v554_v30  ;;  %v1111_v31 = vld [vmem:[%s2632_s4] ss:$0 sm:$0xff] }
  0x3e   :  { %1413 = vmatpush3.bf16.msra.mxu0 %v1412_v38  ;;  %v1108_v38 = vld [vmem:[%s2630_s2] ss:$0 sm:$0xff] }
  0x3f   :  { %1438 = vmatpush1.bf16.msra.mxu1 %v1437_v39  ;;  %1415 = vmatprep.subr.bf16.mxu0 %v1414_v40 }
  0x40   :  { %1439 = vmatprep.subr.bf16.mxu1 %v1634_v51 }
  0x42   :  { %1417 = vmatpush3.bf16.msra.mxu0 %v1416_v45 }
  0x43   :  { %1441 = vmatpush1.bf16.msra.mxu1 %v1440_v46  ;;  %1451 = vmatprep.subr.bf16.mxu0 %v1634_v51 }
  0x44   :  { %1442 = vmatprep.subr.bf16.mxu1 %v1634_v51 }
  0x45   :  { %379 = vmatmul.mubr.f32.vlgmr.msra.gmra.mrb[2].mxu0 %v36_v49 }
  0x46   :  { %1453 = vmatpush3.bf16.msra.mxu0 %v1452_v0  ;;  %1284 = vmatprep.mubr.msk.f32.mxu0 %vm1636_vm2, %v1635_v58  ;;  %v651_v0 = vld [vmem:[%s2631_s7 + $0x48] sm:$0xff] }
  0x47   :  { %1444 = vmatpush1.bf16.msra.mxu1 %v1443_v50  ;;  %1454 = vmatprep.subr.bf16.mxu0 %v1634_v51 }
  0x48   :  { %1445 = vmatprep.subr.bf16.mxu1 %v1634_v51 }
  0x4a   :  { %1456 = vmatpush3.bf16.msra.mxu0 %v1455_v2  ;;  %v1499_v2 = vpack.c.bf16 %v651_v0, %v643_v63  ;;  %v716_v63 = vld [vmem:[%s2631_s7 + $0x250] sm:$0xff] }
  0x4b   :  { %1447 = vmatpush1.bf16.msra.mxu1 %v1446_v54  ;;  %1457 = vmatprep.subr.bf16.mxu0 %v1634_v51  ;;  %v559_v54 = vld [vmem:[%s2629_s5 + $0x58] sm:$0xff] }
  0x4c   :  { %1448 = vmatprep.subr.bf16.mxu1 %v1634_v51  ;;  %v1491_v55 = vpack.c.bf16 %v559_v54, %v558_v53 }
  0x4e   :  { %1459 = vmatpush3.bf16.msra.mxu0 %v1458_v5  ;;  %v1531_v5 = vpack.c.bf16 %v653_v3, %v645_v1  ;;  %v723_v1 = vld [vmem:[%s2631_s7 + $0x288] sm:$0xff]  ;;  %v725_v3 = vld [vmem:[%s2631_s7 + $0x298] sm:$0xff] }
  0x4f   :  { %1450 = vmatpush1.bf16.msra.mxu1 %v1449_v57  ;;  %1460 = vmatprep.subr.bf16.mxu0 %v1634_v51  ;;  %v561_v57 = vld [vmem:[%s2629_s5 + $0x68] sm:$0xff] }
  0x50   :  { %428 = vmatprep.subr.mxu1 %v1635_v58 }
  0x52   :  { %1462 = vmatpush3.bf16.msra.mxu0 %v1461_v8  ;;  %v667_v8 = vld [vmem:[%s2631_s7 + $0xc8] sm:$0xff] }
  0x53   :  { %1109 = vmatpush1.msk.msra.mxu1 %vm170_vm1, %v158_v59  ;;  %1463 = vmatprep.subr.bf16.mxu0 %v1634_v51  ;;  %v1494_v59 = vpack.c.bf16 %v561_v57, %v560_v56  ;;  %v1503_v9 = vpack.c.bf16 %v667_v8, %v659_v7  ;;  %v700_v56 = vld [vmem:[%s2631_s7 + $0x1d0] sm:$0xff]  ;;  %v709_v57 = vld [vmem:[%s2631_s7 + $0x218] sm:$0xff] }
  0x54   :  { %449 = vmatmul.mubr.f32.vlgmr.msra.gmra.mrb[2].mxu1 %v38_v60  ;;  %1475 = vmatprep.subr.bf16.mxu1 %v1634_v51  ;;  %v562_v60 = vld [vmem:[%s2629_s5 + $0x70] sm:$0xff] }
  0x55   :  { %1319 = vmatprep.mubr.msk.f32.mxu1 %vm1636_vm2, %v1635_v58  ;;  %1477 = vmatpush3.bf16.msra.mxu1 %v1476_v24  ;;  %v1497_v62 = vpack.c.bf16 %v563_v61, %v562_v60  ;;  %v1513_v24 = vpack.c.bf16 %v698_v23, %v690_v22  ;;  %v748_v22 = vld [vmem:[%s2631_s7 + $0x350] sm:$0xff]  ;;  %v755_v23 = vld [vmem:[%s2631_s7 + $0x388] sm:$0xff] }
  0x56   :  { %1465 = vmatpush3.bf16.msra.mxu0 %v1464_v11  ;;  %1478 = vmatprep.subr.bf16.mxu1 %v1634_v51  ;;  %v666_v11 = vld [vmem:[%s2631_s7 + $0xc0] sm:$0xff] }
  0x57   :  { %1466 = vmatprep.subr.bf16.mxu0 %v1634_v51  ;;  %v1505_v12 = vpack.c.bf16 %v666_v11, %v658_v10  ;;  %v732_v10 = vld [vmem:[%s2631_s7 + $0x2d0] sm:$0xff] }
  0x59   :  { %1480 = vmatpush3.bf16.msra.mxu1 %v1479_v26  ;;  %v715_v26 = vld [vmem:[%s2631_s7 + $0x248] sm:$0xff] }
  0x5a   :  { %1468 = vmatpush3.bf16.msra.mxu0 %v1467_v14  ;;  %1481 = vmatprep.subr.bf16.mxu1 %v1634_v51  ;;  %v683_v14 = vld [vmem:[%s2631_s7 + $0x148] sm:$0xff]  ;;  %v1515_v27 = vpack.c.bf16 %v715_v26, %v707_v25  ;;  %v757_v26 = vld [vmem:[%s2631_s7 + $0x398] sm:$0xff] }
  0x5b   :  { %1469 = vmatprep.subr.bf16.mxu0 %v1634_v51  ;;  %v1507_v15 = vpack.c.bf16 %v683_v14, %v675_v13  ;;  %v747_v13 = vld [vmem:[%s2631_s7 + $0x348] sm:$0xff]  ;;  %v741_v14 = vld [vmem:[%s2631_s7 + $0x318] sm:$0xff] }
  0x5c   :  { %v763_v25 = vld [vmem:[%s2631_s7 + $0x3c8] sm:$0xff] }
  0x5d   :  { %1483 = vmatpush3.bf16.msra.mxu1 %v1482_v29  ;;  %v714_v29 = vld [vmem:[%s2631_s7 + $0x240] sm:$0xff] }
  0x5e   :  { %1471 = vmatpush3.bf16.msra.mxu0 %v1470_v17  ;;  %1484 = vmatprep.subr.bf16.mxu1 %v1634_v51  ;;  %v682_v17 = vld [vmem:[%s2631_s7 + $0x140] sm:$0xff]  ;;  %v1517_v30 = vpack.c.bf16 %v714_v29, %v706_v28  ;;  %v1527_v28 = vpack.c.bf16 %v763_v25, %v755_v23  ;;  %v711_v23 = vld [vmem:[%s2631_s7 + $0x228] sm:$0xff]  ;;  %v713_v25 = vld [vmem:[%s2631_s7 + $0x238] sm:$0xff] }
  0x5f   :  { %1472 = vmatprep.subr.bf16.mxu0 %v1634_v51  ;;  %v1509_v18 = vpack.c.bf16 %v682_v17, %v674_v16  ;;  %v749_v16 = vld [vmem:[%s2631_s7 + $0x358] sm:$0xff]  ;;  %v738_v17 = vld [vmem:[%s2631_s7 + $0x300] sm:$0xff] }
  0x61   :  { %1486 = vmatpush3.bf16.msra.mxu1 %v1485_v32 }
  0x62   :  { %1474 = vmatpush3.bf16.msra.mxu0 %v1473_v20  ;;  %1487 = vmatprep.subr.bf16.mxu1 %v1634_v51  ;;  %v699_v20 = vld [vmem:[%s2631_s7 + $0x1c8] sm:$0xff] }
  0x63   :  { %1500 = vmatprep.subr.bf16.mxu0 %v1499_v2  ;;  %v1511_v21 = vpack.c.bf16 %v699_v20, %v691_v19  ;;  %v731_v2 = vld [vmem:[%s2631_s7 + $0x2c8] sm:$0xff]  ;;  %v1555_v19 = vpack.c.bf16 %v749_v16, %v741_v14  ;;  %v697_v14 = vld [vmem:[%s2631_s7 + $0x1b8] sm:$0xff] }
  0x65   :  { %1489 = vmatpush3.bf16.msra.mxu1 %v1488_v35  ;;  %v644_v35 = vld [vmem:[%s2631_s7 + $0x10] sm:$0xff] }
  0x66   :  { %1490 = vmatprep.subr.bf16.mxu1 %v1634_v51 }
  0x69   :  { %1492 = vmatpush3.bf16.msra.mxu1 %v1491_v55  ;;  %v692_v55 = vld [vmem:[%s2631_s7 + $0x190] sm:$0xff] }
  0x6a   :  { %1493 = vmatprep.subr.bf16.mxu1 %v1634_v51  ;;  %v1545_v60 = vpack.c.bf16 %v700_v56, %v692_v55 }
  0x6d   :  { %1495 = vmatpush3.bf16.msra.mxu1 %v1494_v59  ;;  %v717_v59 = vld [vmem:[%s2631_s7 + $0x258] sm:$0xff] }
  0x6e   :  { %1496 = vmatprep.subr.bf16.mxu1 %v1634_v51  ;;  %v642_v51 = vld [vmem:[%s2631_s7] sm:$0xff]  ;;  %v1547_v61 = vpack.c.bf16 %v717_v59, %v709_v57 }
  0x6f   :  { %v1501_v6 = vpack.c.bf16 %v650_v4, %v642_v51  ;;  %v1519_v51 = vpack.c.bf16 %v731_v2, %v723_v1  ;;  %v733_v4 = vld [vmem:[%s2631_s7 + $0x2d8] sm:$0xff]  ;;  %v662_v57 = vld [vmem:[%s2631_s7 + $0xa0] sm:$0xff]  ;;  %v687_v2 = vld [vmem:[%s2631_s7 + $0x168] sm:$0xff] }
  0x70   :  { %v1551_v7 = vpack.c.bf16 %v733_v4, %v725_v3  ;;  %v670_v59 = vld [vmem:[%s2631_s7 + $0xe0] sm:$0xff]  ;;  %v681_v3 = vld [vmem:[%s2631_s7 + $0x138] sm:$0xff] }
  0x71   :  { %1498 = vmatpush3.bf16.msra.mxu1 %v1497_v62  ;;  %v708_v62 = vld [vmem:[%s2631_s7 + $0x210] sm:$0xff]  ;;  %v1569_v4 = vpack.c.bf16 %v670_v59, %v662_v57 }
  0x72   :  { %1532 = vmatprep.subr.bf16.mxu1 %v1531_v5  ;;  %v1549_v0 = vpack.c.bf16 %v716_v63, %v708_v62  ;;  %v722_v5 = vld [vmem:[%s2631_s7 + $0x280] sm:$0xff]  ;;  %v664_v62 = vld [vmem:[%s2631_s7 + $0xb0] sm:$0xff] }
  0x73   :  { %v672_v63 = vld [vmem:[%s2631_s7 + $0xf0] sm:$0xff] }
  0x74   :  { %v744_v59 = vld [vmem:[%s2631_s7 + $0x330] sm:$0xff] }
  0xf8   :  { %v1145_v36 = vpop.f32.mrb[0].mxu0 }
  0xf9   :  { %v1180_v37 = vpop.f32.mrb[0].mxu1  ;;  %v1146_v39 = vpop.f32.mrb[1].mxu0 }
  0xfa   :  { %v1147_v40 = vadd.f32 %v1146_v39, %v1145_v36  ;;  %v1181_v41 = vpop.f32.mrb[1].mxu1  ;;  %v652_v36 = vld [vmem:[%s2631_s7 + $0x50] sm:$0xff] }
  0xfb   :  { %v1182_v42 = vadd.f32 %v1181_v41, %v1180_v37  ;;  %v661_v37 = vld [vmem:[%s2631_s7 + $0x98] sm:$0xff]  ;;  %v1533_v39 = vpack.c.bf16 %v652_v36, %v644_v35  ;;  %v660_v41 = vld [vmem:[%s2631_s7 + $0x90] sm:$0xff]  ;;  %v647_v35 = vld [vmem:[%s2631_s7 + $0x28] sm:$0xff] }
  0xfc   :  { %v241_v43 = vadd.f32 %v1147_v40, %v1108_v38  ;;  %v669_v38 = vld [vmem:[%s2631_s7 + $0xd8] sm:$0xff]  ;;  %v655_v36 = vld [vmem:[%s2631_s7 + $0x68] sm:$0xff] }
  0xfd   :  { %v1535_v40 = vpack.c.bf16 %v669_v38, %v661_v37  ;;  %v1563_v38 = vpack.c.bf16 %v655_v36, %v647_v35  ;;  %v727_v35 = vld [vmem:[%s2631_s7 + $0x2a8] sm:$0xff] }
  0xfe   :  { %v311_v44 = vadd.f32 %v1182_v42, %v241_v43  ;;  %v668_v42 = vld [vmem:[%s2631_s7 + $0xd0] sm:$0xff]  ;;  %v735_v36 = vld [vmem:[%s2631_s7 + $0x2e8] sm:$0xff] }
 0x118   :  { %v1215_v45 = vpop.f32.mrb[2].mxu0 }
 0x119   :  { %v1216_v46 = vpop.f32.mrb[3].mxu0 }
 0x11a   :  { %v1217_v47 = vadd.f32 %v1216_v46, %v1215_v45  ;;  %v685_v45 = vld [vmem:[%s2631_s7 + $0x158] sm:$0xff]  ;;  %v1537_v46 = vpack.c.bf16 %v668_v42, %v660_v41  ;;  %v1112_v42 = vld [vmem:[%s2633_s6] ss:$0 sm:$0xff] }
 0x11c   :  { %v381_v48 = vadd.f32 %v1217_v47, %v311_v44  ;;  %v677_v44 = vld [vmem:[%s2631_s7 + $0x118] sm:$0xff] }
 0x11d   :  { %v1539_v47 = vpack.c.bf16 %v685_v45, %v677_v44 }
 0x127   :  { %v450_v49 = vpop.f32.mrb[2].mxu1 }
 0x128   :  { %v451_v50 = vadd.f32 %v450_v49, %v381_v48  ;;  %v452_v52 = vpop.f32.mrb[3].mxu1  ;;  %v676_v48 = vld [vmem:[%s2631_s7 + $0x110] sm:$0xff] }
 0x129   :  { %v684_v49 = vld [vmem:[%s2631_s7 + $0x150] sm:$0xff]  ;;  %v701_v52 = vld [vmem:[%s2631_s7 + $0x1d8] sm:$0xff] }
 0x12a   :  { %1285 = vmatmul.mubr.f32.vlgmr.msra.gmra.mrb[4].mxu0 %v451_v50  ;;  %v693_v50 = vld [vmem:[%s2631_s7 + $0x198] sm:$0xff]  ;;  %v1541_v53 = vpack.c.bf16 %v684_v49, %v676_v48  ;;  %v648_v48 = vld [vmem:[%s2631_s7 + $0x30] sm:$0xff] }
 0x12b   :  { %876 = vmatprep.mubr.f32.mxu0 %v1635_v58  ;;  %1502 = vmatpush1.bf16.msra.mxu0 %v1501_v6  ;;  %v1543_v54 = vpack.c.bf16 %v701_v52, %v693_v50  ;;  %v730_v6 = vld [vmem:[%s2631_s7 + $0x2c0] sm:$0xff]  ;;  %v656_v49 = vld [vmem:[%s2631_s7 + $0x70] sm:$0xff]  ;;  %v663_v50 = vld [vmem:[%s2631_s7 + $0xa8] sm:$0xff] }
 0x12c   :  { %1504 = vmatprep.subr.bf16.mxu0 %v1503_v9  ;;  %v1521_v8 = vpack.c.bf16 %v730_v6, %v722_v5  ;;  %v724_v9 = vld [vmem:[%s2631_s7 + $0x290] sm:$0xff]  ;;  %v671_v52 = vld [vmem:[%s2631_s7 + $0xe8] sm:$0xff]  ;;  %v1597_v56 = vpack.c.bf16 %v656_v49, %v648_v48  ;;  %v1601_v5 = vpack.c.bf16 %v672_v63, %v664_v62  ;;  %v678_v6 = vld [vmem:[%s2631_s7 + $0x120] sm:$0xff] }
 0x12d   :  { %v1553_v11 = vpack.c.bf16 %v732_v10, %v724_v9  ;;  %v680_v10 = vld [vmem:[%s2631_s7 + $0x130] sm:$0xff]  ;;  %v751_v48 = vld [vmem:[%s2631_s7 + $0x368] sm:$0xff]  ;;  %v745_v49 = vld [vmem:[%s2631_s7 + $0x338] sm:$0xff] }
 0x12e   :  { %v767_v62 = vld [vmem:[%s2631_s7 + $0x3e8] sm:$0xff]  ;;  %v761_v63 = vld [vmem:[%s2631_s7 + $0x3b8] sm:$0xff] }
 0x12f   :  { %1506 = vmatpush1.bf16.msra.mxu0 %v1505_v12  ;;  %v739_v12 = vld [vmem:[%s2631_s7 + $0x308] sm:$0xff] }
 0x130   :  { %1508 = vmatprep.subr.bf16.mxu0 %v1507_v15  ;;  %v1523_v15 = vpack.c.bf16 %v747_v13, %v739_v12  ;;  %v695_v12 = vld [vmem:[%s2631_s7 + $0x1a8] sm:$0xff] }
 0x131   :  { %v703_v13 = vld [vmem:[%s2631_s7 + $0x1e8] sm:$0xff] }
 0x133   :  { %1510 = vmatpush1.bf16.msra.mxu0 %v1509_v18  ;;  %v746_v18 = vld [vmem:[%s2631_s7 + $0x340] sm:$0xff] }
 0x134   :  { %1512 = vmatprep.subr.bf16.mxu0 %v1511_v21  ;;  %v1525_v20 = vpack.c.bf16 %v746_v18, %v738_v17  ;;  %v740_v21 = vld [vmem:[%s2631_s7 + $0x310] sm:$0xff]  ;;  %v694_v18 = vld [vmem:[%s2631_s7 + $0x1a0] sm:$0xff] }
 0x137   :  { %1514 = vmatpush1.bf16.msra.mxu0 %v1513_v24  ;;  %v1557_v24 = vpack.c.bf16 %v748_v22, %v740_v21  ;;  %v704_v22 = vld [vmem:[%s2631_s7 + $0x1f0] sm:$0xff] }
 0x138   :  { %1516 = vmatprep.subr.bf16.mxu0 %v1515_v27  ;;  %v765_v27 = vld [vmem:[%s2631_s7 + $0x3d8] sm:$0xff] }
 0x139   :  { %v1559_v29 = vpack.c.bf16 %v765_v27, %v757_v26  ;;  %v721_v26 = vld [vmem:[%s2631_s7 + $0x278] sm:$0xff] }
 0x13b   :  { %1518 = vmatpush1.bf16.msra.mxu0 %v1517_v30  ;;  %v754_v30 = vld [vmem:[%s2631_s7 + $0x380] sm:$0xff] }
 0x13c   :  { %1520 = vmatprep.subr.bf16.mxu0 %v1519_v51  ;;  %v689_v51 = vld [vmem:[%s2631_s7 + $0x178] sm:$0xff] }
 0x13d   :  { %v1603_v9 = vpack.c.bf16 %v689_v51, %v681_v3  ;;  %v758_v51 = vld [vmem:[%s2631_s7 + $0x3a0] sm:$0xff] }
 0x13f   :  { %1522 = vmatpush1.bf16.msra.mxu0 %v1521_v8 }
 0x140   :  { %1524 = vmatprep.subr.bf16.mxu0 %v1523_v15  ;;  %v705_v15 = vld [vmem:[%s2631_s7 + $0x1f8] sm:$0xff] }
 0x141   :  { %v1607_v21 = vpack.c.bf16 %v705_v15, %v697_v14  ;;  %v770_v15 = vld [vmem:[%s2634_s8] sm:$0xff] }
 0x143   :  { %1526 = vmatpush1.bf16.msra.mxu0 %v1525_v20  ;;  %v1575_v20 = vpack.c.bf16 %v703_v13, %v695_v12 }
 0x144   :  { %1528 = vmatprep.subr.bf16.mxu0 %v1527_v28 }
 0x1fd   :  { %v543_v32 = vpop.f32.mrb[4].mxu0 }
 0x1fe   :  { %v544_v33 = vadd.f32 %v1111_v31, %v543_v32  ;;  %v1286_v34 = vpop.f32.mrb[5].mxu0  ;;  %v762_v31 = vld [vmem:[%s2631_s7 + $0x3c0] sm:$0xff]  ;;  %v756_v32 = vld [vmem:[%s2631_s7 + $0x390] sm:$0xff] }
 0x1ff   :  { %v764_v34 = vld [vmem:[%s2631_s7 + $0x3d0] sm:$0xff] }
 0x200   :  { %1630 = vtanh.f32 %v544_v33  ;;  %v1529_v33 = vpack.c.bf16 %v762_v31, %v754_v30  ;;  %v1561_v37 = vpack.c.bf16 %v764_v34, %v756_v32  ;;  %v718_v30 = vld [vmem:[%s2631_s7 + $0x260] sm:$0xff]  ;;  %v1611_v32 = vpack.c.bf16 %v721_v26, %v713_v25  ;;  %v720_v34 = vld [vmem:[%s2631_s7 + $0x270] sm:$0xff] }
 0x202   :  { %1530 = vmatpush1.bf16.msra.mxu0 %v1529_v33  ;;  %v712_v33 = vld [vmem:[%s2631_s7 + $0x230] sm:$0xff] }
 0x203   :  { %1564 = vmatprep.subr.bf16.mxu0 %v1563_v38  ;;  %v737_v38 = vld [vmem:[%s2631_s7 + $0x2f8] sm:$0xff] }
 0x20a   :  { %v1631_v43 = vpop.eup %1630 }
 0x20b   :  { %1320 = vmatmul.mubr.f32.vlgmr.msra.gmra.mrb[4].mxu1 %v1631_v43 }
 0x20c   :  { %1534 = vmatpush1.bf16.msra.mxu1 %v1533_v39  ;;  %947 = vmatprep.mubr.f32.mxu1 %v1635_v58  ;;  %v649_v39 = vld [vmem:[%s2631_s7 + $0x38] sm:$0xff] }
 0x20d   :  { %1536 = vmatprep.subr.bf16.mxu1 %v1535_v40  ;;  %v657_v40 = vld [vmem:[%s2631_s7 + $0x78] sm:$0xff] }
 0x20e   :  { %v1595_v41 = vpack.c.bf16 %v657_v40, %v649_v39  ;;  %v1613_v40 = vpack.c.bf16 %v720_v34, %v712_v33 }
 0x210   :  { %1538 = vmatpush1.bf16.msra.mxu1 %v1537_v46  ;;  %v646_v46 = vld [vmem:[%s2631_s7 + $0x20] sm:$0xff] }
 0x211   :  { %1540 = vmatprep.subr.bf16.mxu1 %v1539_v47  ;;  %v654_v47 = vld [vmem:[%s2631_s7 + $0x60] sm:$0xff] }
 0x212   :  { %v1565_v55 = vpack.c.bf16 %v654_v47, %v646_v46  ;;  %v736_v46 = vld [vmem:[%s2631_s7 + $0x2f0] sm:$0xff]  ;;  %v743_v47 = vld [vmem:[%s2631_s7 + $0x328] sm:$0xff] }
 0x214   :  { %1542 = vmatpush1.bf16.msra.mxu1 %v1541_v53  ;;  %v665_v53 = vld [vmem:[%s2631_s7 + $0xb8] sm:$0xff] }
 0x215   :  { %1544 = vmatprep.subr.bf16.mxu1 %v1543_v54  ;;  %v673_v54 = vld [vmem:[%s2631_s7 + $0xf8] sm:$0xff] }
 0x218   :  { %1546 = vmatpush1.bf16.msra.mxu1 %v1545_v60  ;;  %v1567_v60 = vpack.c.bf16 %v671_v52, %v663_v50  ;;  %v753_v50 = vld [vmem:[%s2631_s7 + $0x378] sm:$0xff] }
 0x219   :  { %1548 = vmatprep.subr.bf16.mxu1 %v1547_v61  ;;  %v1599_v61 = vpack.c.bf16 %v673_v54, %v665_v53  ;;  %v742_v54 = vld [vmem:[%s2631_s7 + $0x320] sm:$0xff]  ;;  %v1619_v57 = vpack.c.bf16 %v753_v50, %v745_v49 }
 0x21c   :  { %1550 = vmatpush1.bf16.msra.mxu1 %v1549_v0  ;;  %v679_v0 = vld [vmem:[%s2631_s7 + $0x128] sm:$0xff] }
 0x21d   :  { %1552 = vmatprep.subr.bf16.mxu1 %v1551_v7  ;;  %v686_v7 = vld [vmem:[%s2631_s7 + $0x160] sm:$0xff]  ;;  %v1571_v8 = vpack.c.bf16 %v687_v2, %v679_v0  ;;  %v769_v0 = vld [vmem:[%s2631_s7 + $0x3f8] sm:$0xff] }
 0x21e   :  { %v1573_v16 = vpack.c.bf16 %v686_v7, %v678_v6  ;;  %v766_v6 = vld [vmem:[%s2631_s7 + $0x3e0] sm:$0xff]  ;;  %v760_v7 = vld [vmem:[%s2631_s7 + $0x3b0] sm:$0xff] }
 0x220   :  { %1554 = vmatpush1.bf16.msra.mxu1 %v1553_v11  ;;  %v688_v11 = vld [vmem:[%s2631_s7 + $0x170] sm:$0xff] }
 0x221   :  { %1556 = vmatprep.subr.bf16.mxu1 %v1555_v19  ;;  %v1605_v17 = vpack.c.bf16 %v688_v11, %v680_v10  ;;  %v702_v19 = vld [vmem:[%s2631_s7 + $0x1e0] sm:$0xff]  ;;  %v772_v11 = vlaneseq }
 0x222   :  { %v1577_v27 = vpack.c.bf16 %v702_v19, %v694_v18 }
 0x223   :  { %v773_v12 = vshrl.u32 %v772_v11, 7 }
 0x224   :  { %1558 = vmatpush1.bf16.msra.mxu1 %v1557_v24  ;;  %v719_v24 = vld [vmem:[%s2631_s7 + $0x268] sm:$0xff] }
 0x225   :  { %1560 = vmatprep.subr.bf16.mxu1 %v1559_v29  ;;  %v710_v29 = vld [vmem:[%s2631_s7 + $0x220] sm:$0xff]  ;;  %v1579_v31 = vpack.c.bf16 %v719_v24, %v711_v23  ;;  %v774_v13 = vsub.s32 0, %v773_v12  ;;  %v782_v14 = vsub.s32 2, %v773_v12 }
 0x226   :  { %v1581_v39 = vpack.c.bf16 %v718_v30, %v710_v29  ;;  %v798_v29 = vsub.s32 6, %v773_v12  ;;  %v794_v30 = vsub.s32 5, %v773_v12 }
 0x227   :  { %v775_v18 = vrot.slane %v770_v15, %v774_v13  ;;  %v783_v19 = vrot.slane %v770_v15, %v782_v14 }
 0x228   :  { %1562 = vmatpush1.bf16.msra.mxu1 %v1561_v37  ;;  %v729_v37 = vld [vmem:[%s2631_s7 + $0x2b8] sm:$0xff]  ;;  %v799_v33 = vrot.slane %v770_v15, %v798_v29  ;;  %v795_v34 = vrot.slane %v770_v15, %v794_v30 }
 0x229   :  { %1596 = vmatprep.subr.bf16.mxu1 %v1595_v41  ;;  %v726_v41 = vld [vmem:[%s2631_s7 + $0x2a0] sm:$0xff] }
 0x2de   :  { %v637_v43 = vpop.f32.mrb[4].mxu1 }
 0x2df   :  { %v638_v44 = vadd.f32 %v1112_v42, %v637_v43  ;;  %v1321_v45 = vpop.f32.mrb[5].mxu1  ;;  %v734_v42 = vld [vmem:[%s2631_s7 + $0x2e0] sm:$0xff]  ;;  %v1583_v43 = vpack.c.bf16 %v735_v36, %v727_v35 }
 0x2e0   :  { %v728_v45 = vld [vmem:[%s2631_s7 + $0x2b0] sm:$0xff]  ;;  %v1585_v52 = vpack.c.bf16 %v734_v42, %v726_v41 }
 0x2e1   :  { %1632 = vtanh.f32 %v638_v44  ;;  %v1615_v44 = vpack.c.bf16 %v737_v38, %v729_v37  ;;  %v1617_v53 = vpack.c.bf16 %v736_v46, %v728_v45 }
 0x2eb   :  { %v2449_v1 = vpop.eup %1632 }
 0x2ec   :  { %877 = vmatmul.mubr.f32.vlgmr.msra.gmra.mrb[6].mxu0 %v2449_v1  ;;  %948 = vmatmul.mubr.f32.vlgmr.msra.gmra.mrb[6].mxu1 %v2449_v1 }
 0x2ed   :  { %1566 = vmatpush1.bf16.msra.mxu0 %v1565_v55  ;;  %1598 = vmatpush1.bf16.msra.mxu1 %v1597_v56  ;;  %v750_v55 = vld [vmem:[%s2631_s7 + $0x360] sm:$0xff]  ;;  %v1587_v56 = vpack.c.bf16 %v751_v48, %v743_v47 }
 0x2ee   :  { %1568 = vmatprep.subr.bf16.mxu0 %v1567_v60  ;;  %1600 = vmatprep.subr.bf16.mxu1 %v1599_v61  ;;  %v752_v60 = vld [vmem:[%s2631_s7 + $0x370] sm:$0xff]  ;;  %v759_v61 = vld [vmem:[%s2631_s7 + $0x3a8] sm:$0xff]  ;;  %v1589_v2 = vpack.c.bf16 %v750_v55, %v742_v54 }
 0x2ef   :  { %1018 = vmatprep.mubr.f32.mxu0 %v1635_v58  ;;  %1089 = vmatprep.mubr.f32.mxu1 %v1635_v58  ;;  %v696_v58 = vld [vmem:[%s2631_s7 + $0x1b0] sm:$0xff]  ;;  %v1621_v3 = vpack.c.bf16 %v752_v60, %v744_v59 }
 0x2f0   :  { %v1609_v28 = vpack.c.bf16 %v704_v22, %v696_v58 }
 0x2f1   :  { %1570 = vmatpush1.bf16.msra.mxu0 %v1569_v4  ;;  %1602 = vmatpush1.bf16.msra.mxu1 %v1601_v5  ;;  %v1591_v4 = vpack.c.bf16 %v767_v62, %v759_v61  ;;  %v1623_v5 = vpack.c.bf16 %v769_v0, %v761_v63 }
 0x2f2   :  { %1572 = vmatprep.subr.bf16.mxu0 %v1571_v8  ;;  %1604 = vmatprep.subr.bf16.mxu1 %v1603_v9  ;;  %v768_v8 = vld [vmem:[%s2631_s7 + $0x3f0] sm:$0xff]  ;;  %v1593_v9 = vpack.c.bf16 %v766_v6, %v758_v51 }
 0x2f3   :  { %v1625_v10 = vpack.c.bf16 %v768_v8, %v760_v7 }
 0x2f5   :  { %1574 = vmatpush1.bf16.msra.mxu0 %v1573_v16  ;;  %1606 = vmatpush1.bf16.msra.mxu1 %v1605_v17  ;;  %v778_v16 = vsub.s32 1, %v773_v12  ;;  %v786_v17 = vsub.s32 3, %v773_v12 }
 0x2f6   :  { %1576 = vmatprep.subr.bf16.mxu0 %v1575_v20  ;;  %1608 = vmatprep.subr.bf16.mxu1 %v1607_v21 }
 0x2f7   :  { %v779_v20 = vrot.slane %v770_v15, %v778_v16  ;;  %v787_v21 = vrot.slane %v770_v15, %v786_v17 }
 0x2f9   :  { %1578 = vmatpush1.bf16.msra.mxu0 %v1577_v27  ;;  %1610 = vmatpush1.bf16.msra.mxu1 %v1609_v28  ;;  %v790_v28 = vsub.s32 4, %v773_v12 }
 0x2fa   :  { %1580 = vmatprep.subr.bf16.mxu0 %v1579_v31  ;;  %1612 = vmatprep.subr.bf16.mxu1 %v1611_v32  ;;  %v802_v31 = vsub.s32 7, %v773_v12 }
 0x2fb   :  { %v791_v32 = vrot.slane %v770_v15, %v790_v28 }
 0x2fc   :  { %v803_v35 = vrot.slane %v770_v15, %v802_v31 }
 0x2fd   :  { %1582 = vmatpush1.bf16.msra.mxu0 %v1581_v39  ;;  %1614 = vmatpush1.bf16.msra.mxu1 %v1613_v40 }
 0x2fe   :  { %1584 = vmatprep.subr.bf16.mxu0 %v1583_v43  ;;  %1616 = vmatprep.subr.bf16.mxu1 %v1615_v44 }
 0x301   :  { %1586 = vmatpush1.bf16.msra.mxu0 %v1585_v52  ;;  %1618 = vmatpush1.bf16.msra.mxu1 %v1617_v53 }
 0x302   :  { %1588 = vmatprep.subr.bf16.mxu0 %v1587_v56  ;;  %1620 = vmatprep.subr.bf16.mxu1 %v1619_v57 }
 0x305   :  { %1590 = vmatpush1.bf16.msra.mxu0 %v1589_v2  ;;  %1622 = vmatpush1.bf16.msra.mxu1 %v1621_v3 }
 0x306   :  { %1592 = vmatprep.subr.bf16.mxu0 %v1591_v4  ;;  %1624 = vmatprep.subr.bf16.mxu1 %v1623_v5 }
 0x309   :  { %1594 = vmatpush1.bf16.msra.mxu0 %v1593_v9  ;;  %1626 = vmatpush1.bf16.msra.mxu1 %v1625_v10 }
 0x30c   :  { %1019 = vmatmul.mubr.f32.vlgmr.msra.gmra.mrb[8].mxu0 %v2449_v1  ;;  %1090 = vmatmul.mubr.f32.vlgmr.msra.gmra.mrb[8].mxu1 %v2449_v1 }
 0x3bf   :  { %v878_v58 = vpop.f32.mrb[6].mxu0  ;;  %v949_v22 = vpop.f32.mrb[6].mxu1 }
 0x3c0   :  { %v879_v23 = vadd.f32 %v878_v58, %v775_v18  ;;  %v950_v24 = vadd.f32 %v949_v22, %v783_v19  ;;  %v880_v25 = vpop.f32.mrb[7].mxu0  ;;  %v951_v1 = vpop.f32.mrb[7].mxu1 }
 0x3c1   :  { %v881_v26 = vadd.f32 %v880_v25, %v779_v20  ;;  %v952_v27 = vadd.f32 %v951_v1, %v787_v21 }
 0x3c2   :  { %1096 = vst [vmem:[%s2635_s9] sm:$0xff] %v879_v23  ;;  %1098 = vst [vmem:[%s2635_s9 + $0x10] sm:$0xff] %v950_v24 }
 0x3c3   :  { %1097 = vst [vmem:[%s2635_s9 + $0x8] sm:$0xff] %v881_v26  ;;  %1099 = vst [vmem:[%s2635_s9 + $0x18] sm:$0xff] %v952_v27 }
 0x3df   :  { %v1020_v36 = vpop.f32.mrb[8].mxu0  ;;  %v1091_v37 = vpop.f32.mrb[8].mxu1 }
 0x3e0   :  { %v1021_v38 = vadd.f32 %v1020_v36, %v791_v32  ;;  %v1092_v39 = vadd.f32 %v1091_v37, %v799_v33  ;;  %v1022_v40 = vpop.f32.mrb[9].mxu0  ;;  %v1093_v41 = vpop.f32.mrb[9].mxu1 }
 0x3e1   :  { %v1023_v42 = vadd.f32 %v1022_v40, %v795_v34  ;;  %v1094_v43 = vadd.f32 %v1093_v41, %v803_v35 }
 0x3e2   :  { %1100 = vst [vmem:[%s2635_s9 + $0x20] sm:$0xff] %v1021_v38  ;;  %1102 = vst [vmem:[%s2635_s9 + $0x30] sm:$0xff] %v1092_v39 }
 0x3e3   :  { %1101 = vst [vmem:[%s2635_s9 + $0x28] sm:$0xff] %v1023_v42  ;;  %1103 = vst.msk [vmem:[%s2635_s9 + $0x38] sm:$0xff] %vm166_vm0, %v1094_v43 }

</bundles_post_ra>
